<compile_context>
chip_gen: v7x
topology: tpu7x:2x2x1
jax: 0.10.0
libtpu: 0.0.40
codegen_flags: <defaults>
</compile_context>

<pallas_src>
from functools import partial

import numpy as np
import jax
import jax.numpy as jnp
from jax import lax
from jax.experimental import pallas as pl
from jax.experimental.pallas import tpu as pltpu


# --------------------------------------------------------------------------
# Fused Pallas kernel: whole BasicBlock for block_n images per grid step
# --------------------------------------------------------------------------
def basic_block_kernel(x_ref, w_ref, sh_ref, o_ref, pad_ref):
    """
    x_ref  : (Nb, H, W*C)        f32  lane-dense input slab (also the residual)
    w_ref  : (9, (W+2)*C, W*C)   bf16 spatially-unrolled band weights,
                                 index = 3*stage + ky, BN scale folded in
    sh_ref : (3, 1, W*C)         f32  folded BN shifts (tiled across W)
    o_ref  : (Nb, H, W*C)        f32  output slab
    pad_ref: (Nb, H+2, (W+2)*C)  bf16 halo scratch; per padded row the lanes
                                 are [interior x=0..W-1 | left halo | right halo]
    """
    Nb, H, WC = x_ref.shape
    KB = pad_ref.shape[2]                 # (W+2)*C
    Hp = H + 2

    # Zero ONLY the 1-pixel halo ring, every grid step (the interior is fully
    # rewritten each stage, so the ring stays zero for all three convs).
    # Never gate this on program_id: under megacore each core owns its scratch.
    zrow = jnp.zeros((Nb, 1, KB), jnp.bfloat16)
    pad_ref[:, 0:1, :] = zrow                                   # top halo row
    pad_ref[:, H + 1:H + 2, :] = zrow                           # bottom halo row
    pad_ref[:, :, WC:KB] = jnp.zeros((Nb, Hp, KB - WC), jnp.bfloat16)  # L/R cols

    def conv_bn(stage, cur):
        # One bf16 cast per stage; lane-aligned interior store.
        pad_ref[:, 1:1 + H, 0:WC] = cur.astype(jnp.bfloat16)
        acc = None
        # 3x3 conv = 3 band matmuls (one per ky); register f32 accumulation.
        for ky in range(3):
            band = pad_ref[:, ky:ky + H, :].reshape(Nb * H, KB)
            d = jnp.dot(band, w_ref[3 * stage + ky],
                        preferred_element_type=jnp.float32)
            acc = d if acc is None else acc + d
        # BN shift added once in the epilogue.
        return (acc + sh_ref[stage]).reshape(Nb, H, WC)

    x = x_ref[...]
    h = jnp.maximum(conv_bn(0, x), 0.0)                 # relu(bn1(conv1(x)))
    h = jnp.maximum(conv_bn(1, h), 0.0)                 # relu(bn2(conv2(.)))
    o_ref[...] = jnp.maximum(conv_bn(2, h) + x, 0.0)    # relu(bn3(conv3(.)) + x)


# --------------------------------------------------------------------------
# Wrapper
# --------------------------------------------------------------------------
@partial(jax.jit, static_argnames=("block_n",))
def basic_block_forward(x, w_all, sh_all, block_n=1):
    """x: (N, H, W, C) float32 NHWC. kernel=3, stride=1, downsample=None."""
    N, H, W, C = x.shape
    WC = W * C
    KB = w_all.shape[1]
    assert N % block_n == 0
    x_slab = x.reshape(N, H, WC)            # free host-side layout change

    out = pl.pallas_call(
        basic_block_kernel,
        out_shape=jax.ShapeDtypeStruct((N, H, WC), jnp.float32),
        grid=(N // block_n,),
        in_specs=[
            pl.BlockSpec((block_n, H, WC), lambda n: (n, 0, 0)),
            pl.BlockSpec((9, KB, WC), lambda n: (0, 0, 0)),
            pl.BlockSpec((3, 1, WC), lambda n: (0, 0, 0)),
        ],
        out_specs=pl.BlockSpec((block_n, H, WC), lambda n: (n, 0, 0)),
        scratch_shapes=[
            pltpu.VMEM((block_n, H + 2, KB), jnp.bfloat16),   # bf16 halo scratch
        ],
        compiler_params=pltpu.CompilerParams(dimension_semantics=("parallel",)),
    )(x_slab, w_all, sh_all)
    return out.reshape(N, H, W, C)


# --------------------------------------------------------------------------
# Host-side weight packing: fold BN scale, spatially unroll the conv along W
# --------------------------------------------------------------------------
def pack_params(params, W):
    """Returns (w_all (9,(W+2)*C,W*C) bf16, sh_all (3,1,W*C) f32)."""
    w1, s1, b1, w2, s2, b2, w3, s3, b3 = params
    C = w1.shape[-1]
    WC, KB = W * C, (W + 2) * C

    def unroll(w, s):
        # conv(x, w)*scale + shift == conv(x, w*scale) + shift
        wf = np.asarray(w * s[0], np.float32).reshape(3, 3, C, C)  # (ky,kx,ci,co)
        bands = np.zeros((3, KB, WC), np.float32)
        for ky in range(3):
            for xo in range(W):
                for kx in range(3):
                    xi = xo + kx - 1
                    if 0 <= xi < W:
                        bands[ky, xi * C:(xi + 1) * C, xo * C:(xo + 1) * C] = wf[ky, kx]
        # rows [WC, KB) correspond to the always-zero halo columns -> stay 0
        return bands

    w_all = np.concatenate([unroll(w1, s1), unroll(w2, s2), unroll(w3, s3)], axis=0)
    sh_all = np.stack([np.tile(np.asarray(b, np.float32), (1, W))
                       for b in (b1, b2, b3)], axis=0)
    return jnp.asarray(w_all, jnp.bfloat16), jnp.asarray(sh_all, jnp.float32)


# --------------------------------------------------------------------------
# Parameter construction (deterministic, synthetic) + pure-JAX reference
# --------------------------------------------------------------------------
def _fold_bn(gamma, beta, mean, var, eps=1e-5):
    scale = gamma * lax.rsqrt(var + eps)
    shift = beta - mean * scale
    return scale[None, :], shift[None, :]


def make_params(key, cin, cout):
    ks = jax.random.split(key, 5)
    # conv weight stored tap-major: (9, Cin, Cout), tap = ky*3 + kx
    w = jax.random.normal(ks[0], (9, cin, cout), jnp.float32) * 0.1
    gamma = 1.0 + 0.1 * jax.random.normal(ks[1], (cout,), jnp.float32)
    beta = 0.1 * jax.random.normal(ks[2], (cout,), jnp.float32)
    mean = 0.1 * jax.random.normal(ks[3], (cout,), jnp.float32)
    var = jnp.abs(jax.random.normal(ks[4], (cout,), jnp.float32)) + 0.5
    scale, shift = _fold_bn(gamma, beta, mean, var)
    return w, scale, shift


def _ref_conv_bn(x, w, scale, shift):
    # Emulate the kernel arithmetic: bf16-rounded folded weights and bf16-
    # rounded activations as matmul operands, f32 accumulation.
    wf = (w * scale[0]).astype(jnp.bfloat16).astype(jnp.float32)
    xq = x.astype(jnp.bfloat16).astype(jnp.float32)
    w_hwio = wf.reshape(3, 3, w.shape[1], w.shape[2])
    y = lax.conv_general_dilated(
        xq, w_hwio, window_strides=(1, 1), padding="SAME",
        dimension_numbers=("NHWC", "HWIO", "NHWC"),
        precision=lax.Precision.HIGHEST)
    return y + shift[0]


def basic_block_reference(x, params):
    w1, s1, b1, w2, s2, b2, w3, s3, b3 = params
    out = jnp.maximum(_ref_conv_bn(x, w1, s1, b1), 0.0)
    out = jnp.maximum(_ref_conv_bn(out, w2, s2, b2), 0.0)
    out = _ref_conv_bn(out, w3, s3, b3) + x
    return jnp.maximum(out, 0.0)


# --------------------------------------------------------------------------
if __name__ == "__main__":
    # inplanes = planes = 8 (residual requires match); W*C = 128 -> lane-dense.
    N, H, W, C = 2, 16, 16, 8

    key = jax.random.PRNGKey(0)
    kx, k1, k2, k3 = jax.random.split(key, 4)
    x = jax.random.normal(kx, (N, H, W, C), jnp.float32)

    p1 = make_params(k1, C, C)
    p2 = make_params(k2, C, C)
    p3 = make_params(k3, C, C)
    params = (*p1, *p2, *p3)
    w_all, sh_all = pack_params(params, W)

    # block_n=1 keeps grid=(2,) so both v7x TensorCores get work; raise
    # block_n (folds images into matmul M) on single-TC v5e/v6e.
    out = jax.block_until_ready(basic_block_forward(x, w_all, sh_all, block_n=1))

    # sanity check vs a pure-JAX reference with the same bf16-rounded operands
    ref = jax.block_until_ready(basic_block_reference(x, params))
    assert out.shape == (N, H, W, C)
    err = float(jnp.max(jnp.abs(out - ref)))
    assert err < 2e-3, f"mismatch vs reference: {err}"

    print("KERNEL_OK")
</pallas_src>

<mosaic_0001>
module attributes {stable_mosaic.version = 11 : i64} {
  func.func @basic_block_kernel(%arg0: i32, %arg1: memref<1x16x128xf32, #tpu.memory_space<vmem>>, %arg2: memref<9x144x128xbf16, #tpu.memory_space<vmem>>, %arg3: memref<3x1x128xf32, #tpu.memory_space<vmem>>, %arg4: memref<1x16x128xf32, #tpu.memory_space<vmem>>, %arg5: memref<1x18x144xbf16, #tpu.memory_space<vmem>>) attributes {dimension_semantics = [#tpu.dimension_semantics<parallel>], iteration_bounds = array<i64: 2>, scalar_prefetch = 0 : i64, scratch_operands = 1 : i64, tpu.core_type = #tpu.core_type<tc>, window_params = [{transform_indices = @transform_0, window_bounds = array<i64: 1, 16, 128>}, {pipeline_mode = #tpu.pipeline_mode<synchronous>, transform_indices = @transform_1, window_bounds = array<i64: 9, 144, 128>}, {pipeline_mode = #tpu.pipeline_mode<synchronous>, transform_indices = @transform_2, window_bounds = array<i64: 3, 1, 128>}, {transform_indices = @transform_3, window_bounds = array<i64: 1, 16, 128>}]} {
    %cst = arith.constant 0.000000e+00 : bf16
    %0 = vector.broadcast %cst : bf16 to vector<1x1x144xbf16>
    %c0 = arith.constant 0 : index
    %c0_0 = arith.constant 0 : index
    %c0_1 = arith.constant 0 : index
    %1 = vector.load %arg5[%c0, %c0_0, %c0_1] : memref<1x18x144xbf16, #tpu.memory_space<vmem>>, vector<1x1x144xbf16>
    tpu.vector_store %arg5[%c0, %c0_0, %c0_1], %0 {strides = array<i32>} : memref<1x18x144xbf16, #tpu.memory_space<vmem>>, vector<1x1x144xbf16>,
    %c0_2 = arith.constant 0 : index
    %c17 = arith.constant 17 : index
    %c0_3 = arith.constant 0 : index
    %2 = vector.load %arg5[%c0_2, %c17, %c0_3] : memref<1x18x144xbf16, #tpu.memory_space<vmem>>, vector<1x1x144xbf16>
    tpu.vector_store %arg5[%c0_2, %c17, %c0_3], %0 {strides = array<i32>} : memref<1x18x144xbf16, #tpu.memory_space<vmem>>, vector<1x1x144xbf16>,
    %cst_4 = arith.constant 0.000000e+00 : bf16
    %3 = vector.broadcast %cst_4 : bf16 to vector<1x18x16xbf16>
    %c0_5 = arith.constant 0 : index
    %c0_6 = arith.constant 0 : index
    %c128 = arith.constant 128 : index
    %4 = vector.load %arg5[%c0_5, %c0_6, %c128] : memref<1x18x144xbf16, #tpu.memory_space<vmem>>, vector<1x18x16xbf16>
    tpu.vector_store %arg5[%c0_5, %c0_6, %c128], %3 {strides = array<i32>} : memref<1x18x144xbf16, #tpu.memory_space<vmem>>, vector<1x18x16xbf16>,
    %c0_7 = arith.constant 0 : index
    %c0_8 = arith.constant 0 : index
    %c0_9 = arith.constant 0 : index
    %5 = vector.load %arg1[%c0_7, %c0_8, %c0_9] : memref<1x16x128xf32, #tpu.memory_space<vmem>>, vector<1x16x128xf32>
    %6 = arith.truncf %5 : vector<1x16x128xf32> to vector<1x16x128xbf16>
    %c0_10 = arith.constant 0 : index
    %c1 = arith.constant 1 : index
    %c0_11 = arith.constant 0 : index
    %7 = vector.load %arg5[%c0_10, %c1, %c0_11] : memref<1x18x144xbf16, #tpu.memory_space<vmem>>, vector<1x16x128xbf16>
    tpu.vector_store %arg5[%c0_10, %c1, %c0_11], %6 {strides = array<i32>} : memref<1x18x144xbf16, #tpu.memory_space<vmem>>, vector<1x16x128xbf16>,
    %c0_12 = arith.constant 0 : index
    %c0_13 = arith.constant 0 : index
    %c0_14 = arith.constant 0 : index
    %8 = vector.load %arg5[%c0_12, %c0_13, %c0_14] : memref<1x18x144xbf16, #tpu.memory_space<vmem>>, vector<1x16x144xbf16>
    %9 = vector.shape_cast %8 : vector<1x16x144xbf16> to vector<16x144xbf16>
    %c0_15 = arith.constant 0 : index
    %c0_16 = arith.constant 0 : index
    %c0_17 = arith.constant 0 : index
    %10 = vector.load %arg2[%c0_15, %c0_16, %c0_17] : memref<9x144x128xbf16, #tpu.memory_space<vmem>>, vector<1x144x128xbf16>
    %11 = vector.shape_cast %10 : vector<1x144x128xbf16> to vector<144x128xbf16>
    %cst_18 = arith.constant dense<0.000000e+00> : vector<16x128xf32>
    %12 = tpu.matmul %9, %11, %cst_18 {dimension_numbers = #tpu.dot_dimension_numbers<[1], [0], [0], [1], [0, 0, 1, 1], [], []>} : vector<16x144xbf16>, vector<144x128xbf16>, vector<16x128xf32> -> vector<16x128xf32>
    %c0_19 = arith.constant 0 : index
    %c1_20 = arith.constant 1 : index
    %c0_21 = arith.constant 0 : index
    %13 = vector.load %arg5[%c0_19, %c1_20, %c0_21] : memref<1x18x144xbf16, #tpu.memory_space<vmem>>, vector<1x16x144xbf16>
    %14 = vector.shape_cast %13 : vector<1x16x144xbf16> to vector<16x144xbf16>
    %c1_22 = arith.constant 1 : index
    %c0_23 = arith.constant 0 : index
    %c0_24 = arith.constant 0 : index
    %15 = vector.load %arg2[%c1_22, %c0_23, %c0_24] : memref<9x144x128xbf16, #tpu.memory_space<vmem>>, vector<1x144x128xbf16>
    %16 = vector.shape_cast %15 : vector<1x144x128xbf16> to vector<144x128xbf16>
    %cst_25 = arith.constant dense<0.000000e+00> : vector<16x128xf32>
    %17 = tpu.matmul %14, %16, %cst_25 {dimension_numbers = #tpu.dot_dimension_numbers<[1], [0], [0], [1], [0, 0, 1, 1], [], []>} : vector<16x144xbf16>, vector<144x128xbf16>, vector<16x128xf32> -> vector<16x128xf32>
    %18 = arith.addf %12, %17 : vector<16x128xf32>
    %c0_26 = arith.constant 0 : index
    %c2 = arith.constant 2 : index
    %c0_27 = arith.constant 0 : index
    %19 = vector.load %arg5[%c0_26, %c2, %c0_27] : memref<1x18x144xbf16, #tpu.memory_space<vmem>>, vector<1x16x144xbf16>
    %20 = vector.shape_cast %19 : vector<1x16x144xbf16> to vector<16x144xbf16>
    %c2_28 = arith.constant 2 : index
    %c0_29 = arith.constant 0 : index
    %c0_30 = arith.constant 0 : index
    %21 = vector.load %arg2[%c2_28, %c0_29, %c0_30] : memref<9x144x128xbf16, #tpu.memory_space<vmem>>, vector<1x144x128xbf16>
    %22 = vector.shape_cast %21 : vector<1x144x128xbf16> to vector<144x128xbf16>
    %cst_31 = arith.constant dense<0.000000e+00> : vector<16x128xf32>
    %23 = tpu.matmul %20, %22, %cst_31 {dimension_numbers = #tpu.dot_dimension_numbers<[1], [0], [0], [1], [0, 0, 1, 1], [], []>} : vector<16x144xbf16>, vector<144x128xbf16>, vector<16x128xf32> -> vector<16x128xf32>
    %24 = arith.addf %18, %23 : vector<16x128xf32>
    %c0_32 = arith.constant 0 : index
    %c0_33 = arith.constant 0 : index
    %c0_34 = arith.constant 0 : index
    %25 = vector.load %arg3[%c0_32, %c0_33, %c0_34] : memref<3x1x128xf32, #tpu.memory_space<vmem>>, vector<1x1x128xf32>
    %26 = vector.shape_cast %25 : vector<1x1x128xf32> to vector<1x128xf32>
    %27 = vector.broadcast %26 : vector<1x128xf32> to vector<16x128xf32>
    %28 = arith.addf %24, %27 : vector<16x128xf32>
    %29 = vector.shape_cast %28 : vector<16x128xf32> to vector<1x16x128xf32>
    %cst_35 = arith.constant 0.000000e+00 : f32
    %30 = vector.broadcast %cst_35 : f32 to vector<1x16x128xf32>
    %31 = arith.maximumf %29, %30 : vector<1x16x128xf32>
    %32 = arith.truncf %31 : vector<1x16x128xf32> to vector<1x16x128xbf16>
    %c0_36 = arith.constant 0 : index
    %c1_37 = arith.constant 1 : index
    %c0_38 = arith.constant 0 : index
    %33 = vector.load %arg5[%c0_36, %c1_37, %c0_38] : memref<1x18x144xbf16, #tpu.memory_space<vmem>>, vector<1x16x128xbf16>
    tpu.vector_store %arg5[%c0_36, %c1_37, %c0_38], %32 {strides = array<i32>} : memref<1x18x144xbf16, #tpu.memory_space<vmem>>, vector<1x16x128xbf16>,
    %c0_39 = arith.constant 0 : index
    %c0_40 = arith.constant 0 : index
    %c0_41 = arith.constant 0 : index
    %34 = vector.load %arg5[%c0_39, %c0_40, %c0_41] : memref<1x18x144xbf16, #tpu.memory_space<vmem>>, vector<1x16x144xbf16>
    %35 = vector.shape_cast %34 : vector<1x16x144xbf16> to vector<16x144xbf16>
    %c3 = arith.constant 3 : index
    %c0_42 = arith.constant 0 : index
    %c0_43 = arith.constant 0 : index
    %36 = vector.load %arg2[%c3, %c0_42, %c0_43] : memref<9x144x128xbf16, #tpu.memory_space<vmem>>, vector<1x144x128xbf16>
    %37 = vector.shape_cast %36 : vector<1x144x128xbf16> to vector<144x128xbf16>
    %cst_44 = arith.constant dense<0.000000e+00> : vector<16x128xf32>
    %38 = tpu.matmul %35, %37, %cst_44 {dimension_numbers = #tpu.dot_dimension_numbers<[1], [0], [0], [1], [0, 0, 1, 1], [], []>} : vector<16x144xbf16>, vector<144x128xbf16>, vector<16x128xf32> -> vector<16x128xf32>
    %c0_45 = arith.constant 0 : index
    %c1_46 = arith.constant 1 : index
    %c0_47 = arith.constant 0 : index
    %39 = vector.load %arg5[%c0_45, %c1_46, %c0_47] : memref<1x18x144xbf16, #tpu.memory_space<vmem>>, vector<1x16x144xbf16>
    %40 = vector.shape_cast %39 : vector<1x16x144xbf16> to vector<16x144xbf16>
    %c4 = arith.constant 4 : index
    %c0_48 = arith.constant 0 : index
    %c0_49 = arith.constant 0 : index
    %41 = vector.load %arg2[%c4, %c0_48, %c0_49] : memref<9x144x128xbf16, #tpu.memory_space<vmem>>, vector<1x144x128xbf16>
    %42 = vector.shape_cast %41 : vector<1x144x128xbf16> to vector<144x128xbf16>
    %cst_50 = arith.constant dense<0.000000e+00> : vector<16x128xf32>
    %43 = tpu.matmul %40, %42, %cst_50 {dimension_numbers = #tpu.dot_dimension_numbers<[1], [0], [0], [1], [0, 0, 1, 1], [], []>} : vector<16x144xbf16>, vector<144x128xbf16>, vector<16x128xf32> -> vector<16x128xf32>
    %44 = arith.addf %38, %43 : vector<16x128xf32>
    %c0_51 = arith.constant 0 : index
    %c2_52 = arith.constant 2 : index
    %c0_53 = arith.constant 0 : index
    %45 = vector.load %arg5[%c0_51, %c2_52, %c0_53] : memref<1x18x144xbf16, #tpu.memory_space<vmem>>, vector<1x16x144xbf16>
    %46 = vector.shape_cast %45 : vector<1x16x144xbf16> to vector<16x144xbf16>
    %c5 = arith.constant 5 : index
    %c0_54 = arith.constant 0 : index
    %c0_55 = arith.constant 0 : index
    %47 = vector.load %arg2[%c5, %c0_54, %c0_55] : memref<9x144x128xbf16, #tpu.memory_space<vmem>>, vector<1x144x128xbf16>
    %48 = vector.shape_cast %47 : vector<1x144x128xbf16> to vector<144x128xbf16>
    %cst_56 = arith.constant dense<0.000000e+00> : vector<16x128xf32>
    %49 = tpu.matmul %46, %48, %cst_56 {dimension_numbers = #tpu.dot_dimension_numbers<[1], [0], [0], [1], [0, 0, 1, 1], [], []>} : vector<16x144xbf16>, vector<144x128xbf16>, vector<16x128xf32> -> vector<16x128xf32>
    %50 = arith.addf %44, %49 : vector<16x128xf32>
    %c1_57 = arith.constant 1 : index
    %c0_58 = arith.constant 0 : index
    %c0_59 = arith.constant 0 : index
    %51 = vector.load %arg3[%c1_57, %c0_58, %c0_59] : memref<3x1x128xf32, #tpu.memory_space<vmem>>, vector<1x1x128xf32>
    %52 = vector.shape_cast %51 : vector<1x1x128xf32> to vector<1x128xf32>
    %53 = vector.broadcast %52 : vector<1x128xf32> to vector<16x128xf32>
    %54 = arith.addf %50, %53 : vector<16x128xf32>
    %55 = vector.shape_cast %54 : vector<16x128xf32> to vector<1x16x128xf32>
    %cst_60 = arith.constant 0.000000e+00 : f32
    %56 = vector.broadcast %cst_60 : f32 to vector<1x16x128xf32>
    %57 = arith.maximumf %55, %56 : vector<1x16x128xf32>
    %58 = arith.truncf %57 : vector<1x16x128xf32> to vector<1x16x128xbf16>
    %c0_61 = arith.constant 0 : index
    %c1_62 = arith.constant 1 : index
    %c0_63 = arith.constant 0 : index
    %59 = vector.load %arg5[%c0_61, %c1_62, %c0_63] : memref<1x18x144xbf16, #tpu.memory_space<vmem>>, vector<1x16x128xbf16>
    tpu.vector_store %arg5[%c0_61, %c1_62, %c0_63], %58 {strides = array<i32>} : memref<1x18x144xbf16, #tpu.memory_space<vmem>>, vector<1x16x128xbf16>,
    %c0_64 = arith.constant 0 : index
    %c0_65 = arith.constant 0 : index
    %c0_66 = arith.constant 0 : index
    %60 = vector.load %arg5[%c0_64, %c0_65, %c0_66] : memref<1x18x144xbf16, #tpu.memory_space<vmem>>, vector<1x16x144xbf16>
    %61 = vector.shape_cast %60 : vector<1x16x144xbf16> to vector<16x144xbf16>
    %c6 = arith.constant 6 : index
    %c0_67 = arith.constant 0 : index
    %c0_68 = arith.constant 0 : index
    %62 = vector.load %arg2[%c6, %c0_67, %c0_68] : memref<9x144x128xbf16, #tpu.memory_space<vmem>>, vector<1x144x128xbf16>
    %63 = vector.shape_cast %62 : vector<1x144x128xbf16> to vector<144x128xbf16>
    %cst_69 = arith.constant dense<0.000000e+00> : vector<16x128xf32>
    %64 = tpu.matmul %61, %63, %cst_69 {dimension_numbers = #tpu.dot_dimension_numbers<[1], [0], [0], [1], [0, 0, 1, 1], [], []>} : vector<16x144xbf16>, vector<144x128xbf16>, vector<16x128xf32> -> vector<16x128xf32>
    %c0_70 = arith.constant 0 : index
    %c1_71 = arith.constant 1 : index
    %c0_72 = arith.constant 0 : index
    %65 = vector.load %arg5[%c0_70, %c1_71, %c0_72] : memref<1x18x144xbf16, #tpu.memory_space<vmem>>, vector<1x16x144xbf16>
    %66 = vector.shape_cast %65 : vector<1x16x144xbf16> to vector<16x144xbf16>
    %c7 = arith.constant 7 : index
    %c0_73 = arith.constant 0 : index
    %c0_74 = arith.constant 0 : index
    %67 = vector.load %arg2[%c7, %c0_73, %c0_74] : memref<9x144x128xbf16, #tpu.memory_space<vmem>>, vector<1x144x128xbf16>
    %68 = vector.shape_cast %67 : vector<1x144x128xbf16> to vector<144x128xbf16>
    %cst_75 = arith.constant dense<0.000000e+00> : vector<16x128xf32>
    %69 = tpu.matmul %66, %68, %cst_75 {dimension_numbers = #tpu.dot_dimension_numbers<[1], [0], [0], [1], [0, 0, 1, 1], [], []>} : vector<16x144xbf16>, vector<144x128xbf16>, vector<16x128xf32> -> vector<16x128xf32>
    %70 = arith.addf %64, %69 : vector<16x128xf32>
    %c0_76 = arith.constant 0 : index
    %c2_77 = arith.constant 2 : index
    %c0_78 = arith.constant 0 : index
    %71 = vector.load %arg5[%c0_76, %c2_77, %c0_78] : memref<1x18x144xbf16, #tpu.memory_space<vmem>>, vector<1x16x144xbf16>
    %72 = vector.shape_cast %71 : vector<1x16x144xbf16> to vector<16x144xbf16>
    %c8 = arith.constant 8 : index
    %c0_79 = arith.constant 0 : index
    %c0_80 = arith.constant 0 : index
    %73 = vector.load %arg2[%c8, %c0_79, %c0_80] : memref<9x144x128xbf16, #tpu.memory_space<vmem>>, vector<1x144x128xbf16>
    %74 = vector.shape_cast %73 : vector<1x144x128xbf16> to vector<144x128xbf16>
    %cst_81 = arith.constant dense<0.000000e+00> : vector<16x128xf32>
    %75 = tpu.matmul %72, %74, %cst_81 {dimension_numbers = #tpu.dot_dimension_numbers<[1], [0], [0], [1], [0, 0, 1, 1], [], []>} : vector<16x144xbf16>, vector<144x128xbf16>, vector<16x128xf32> -> vector<16x128xf32>
    %76 = arith.addf %70, %75 : vector<16x128xf32>
    %c2_82 = arith.constant 2 : index
    %c0_83 = arith.constant 0 : index
    %c0_84 = arith.constant 0 : index
    %77 = vector.load %arg3[%c2_82, %c0_83, %c0_84] : memref<3x1x128xf32, #tpu.memory_space<vmem>>, vector<1x1x128xf32>
    %78 = vector.shape_cast %77 : vector<1x1x128xf32> to vector<1x128xf32>
    %79 = vector.broadcast %78 : vector<1x128xf32> to vector<16x128xf32>
    %80 = arith.addf %76, %79 : vector<16x128xf32>
    %81 = vector.shape_cast %80 : vector<16x128xf32> to vector<1x16x128xf32>
    %82 = arith.addf %81, %5 : vector<1x16x128xf32>
    %cst_85 = arith.constant 0.000000e+00 : f32
    %83 = vector.broadcast %cst_85 : f32 to vector<1x16x128xf32>
    %84 = arith.maximumf %82, %83 : vector<1x16x128xf32>
    %c0_86 = arith.constant 0 : index
    %c0_87 = arith.constant 0 : index
    %c0_88 = arith.constant 0 : index
    %85 = vector.load %arg4[%c0_86, %c0_87, %c0_88] : memref<1x16x128xf32, #tpu.memory_space<vmem>>, vector<1x16x128xf32>
    tpu.vector_store %arg4[%c0_86, %c0_87, %c0_88], %84 {strides = array<i32>} : memref<1x16x128xf32, #tpu.memory_space<vmem>>, vector<1x16x128xf32>,
    return
  }
  func.func @transform_0(%arg0: i32) -> (i32, i32, i32) {
    %c0_i32 = arith.constant 0 : i32
    %c0_i32_0 = arith.constant 0 : i32
    %c0_i32_1 = arith.constant 0 : i32
    return %arg0, %c0_i32, %c0_i32_0 : i32, i32, i32
  }
  func.func @transform_1(%arg0: i32) -> (i32, i32, i32) {
    %c0_i32 = arith.constant 0 : i32
    %c0_i32_0 = arith.constant 0 : i32
    %c0_i32_1 = arith.constant 0 : i32
    %c0_i32_2 = arith.constant 0 : i32
    return %c0_i32, %c0_i32_0, %c0_i32_1 : i32, i32, i32
  }
  func.func @transform_2(%arg0: i32) -> (i32, i32, i32) {
    %c0_i32 = arith.constant 0 : i32
    %c0_i32_0 = arith.constant 0 : i32
    %c0_i32_1 = arith.constant 0 : i32
    %c0_i32_2 = arith.constant 0 : i32
    return %c0_i32, %c0_i32_0, %c0_i32_1 : i32, i32, i32
  }
  func.func @transform_3(%arg0: i32) -> (i32, i32, i32) {
    %c0_i32 = arith.constant 0 : i32
    %c0_i32_0 = arith.constant 0 : i32
    %c0_i32_1 = arith.constant 0 : i32
    return %arg0, %c0_i32, %c0_i32_0 : i32, i32, i32
  }
}

</mosaic_0001>

<bundles_post_ra>
// kernel: basic_block_forward.1
= control target key start
LH: loop header
LB: loop body
LE: loop exit
PB: predicated region body
PF: predicated region fallthrough
CT: control target
= control target key end

     0   :  { %s2038_s12 = smov 0   ;;  %s2476_s0 = inlined_call_operand.vmem [shape: f32[2,16,128], index: 0, kind: input, shape index: {}]   ;;  %s2477_s1 = inlined_call_operand.vmem [shape: bf16[9,144,128], index: 1, kind: input, shape index: {}]   ;;  %s2478_s2 = inlined_call_operand.vmem [shape: f32[3,1,128], index: 2, kind: input, shape index: {}]   ;;  %s2479_s3 = inlined_call_operand.vmem [shape: f32[2,16,128], index: 3, kind: output, shape index: {}]  }
   0x1 LB: > { %s1617_s13 = sadd.s32 4294967295, %s2015_s12   ;;  %p1621_p0 = scmp.ge.s32.totalorder %s2015_s12, 1  ;;  %s2015_s12 = sphi %s2038_s12, %s13_s12  }
   0x2   : > { %p137_p1 = scmp.lt.s32.totalorder %s2015_s12, 3 }
   0x4   : > { %p138_p2 = pnand %p1621_p0, %p137_p1 }
   0x5   : > { %v1908_v0 = vld [vmem:[%s2477_s1 + $0x48] sm:$0xff] (!%p138_p2)   ;;  %v2017_v1 = vmov (!%p138_p2), 0   ;;  %v1909_v2 = vld [vmem:[%s2477_s1] sm:$0xff] (!%p138_p2)   ;;  %v1910_v3 = vld [vmem:[%s2477_s1 + $0x50] sm:$0xff] (!%p138_p2)   ;;  %p161_p3 = scmp.lt.s32.totalorder (!%p138_p2), %s1617_s13, 1  ;;  %vm190_vm0 = vcmask (!%p138_p2), 125952  }
   0x6   : > { %141 = sbr.rel (%p138_p2) target bundleno = 869 (0x365), region = 32  ;;  %371 = vmatprep.subr.bf16.mxu0 (!%p138_p2), %v2017_v1  ;;  %469 = vmatprep.subr.bf16.mxu1 (!%p138_p2), %v2017_v1  ;;  %v1911_v4 = vld [vmem:[%s2477_s1 + $0x8] sm:$0xff] (!%p138_p2)   ;;  %v1912_v5 = vld [vmem:[%s2477_s1 + $0x58] sm:$0xff] (!%p138_p2)   ;;  %v1913_v6 = vld [vmem:[%s2477_s1 + $0x10] sm:$0xff] (!%p138_p2)   ;;  %192 = vst.msk [vmem:[#allocation2 + $0xc] sm:$0xf] (!%p138_p2), %vm190_vm0, %v2017_v1 }
   0x7   : > { %372 = vmatpush1.bf16.msra.mxu0 (!%p138_p2), %v1908_v0  ;;  %470 = vmatpush1.bf16.msra.mxu1 (!%p138_p2), %v1909_v2  ;;  %v1914_v7 = vld [vmem:[%s2477_s1 + $0x60] sm:$0xff] (!%p138_p2)   ;;  %v1915_v8 = vld [vmem:[%s2477_s1 + $0x18] sm:$0xff] (!%p138_p2)   ;;  %v1916_v9 = vld [vmem:[%s2477_s1 + $0x68] sm:$0xff] (!%p138_p2)   ;;  %vm172_vm1 = vcmask (!%p138_p2), 1040384   ;;  %vm175_vm2 = vcmask (!%p138_p2), 126980   ;;  %vm193_vm14 = vcmask (!%p138_p2), 122880  }
   0x8   : > { %373 = vmatprep.subr.bf16.mxu0 (!%p138_p2), %v2017_v1  ;;  %471 = vmatprep.subr.bf16.mxu1 (!%p138_p2), %v2017_v1  ;;  %v1917_v10 = vld [vmem:[%s2477_s1 + $0x20] sm:$0xff] (!%p138_p2)   ;;  %v1918_v11 = vld [vmem:[%s2477_s1 + $0x70] sm:$0xff] (!%p138_p2)   ;;  %vm173_vm3 = vsmask.f32 (!%p138_p2), 256  ;;  %vm176_vm4 = vsmask.f32 (!%p138_p2), 4352 }
   0x9   : > { %v1919_v12 = vld [vmem:[%s2477_s1 + $0x28] sm:$0xff] (!%p138_p2)   ;;  %vm2107_vm5 = vmand (!%p138_p2), %vm172_vm1, %vm173_vm3  ;;  %v179_v14 = vld [vmem:[#allocation2] sm:$0x11] (!%p138_p2)  ;;  %vm182_vm6 = vsmask.f32 (!%p138_p2), 7938  ;;  %vm225_vm15 = vcmask (!%p138_p2), 1043456  }
   0xa   : > { %v1920_v15 = vld [vmem:[%s2477_s1 + $0x78] sm:$0xff] (!%p138_p2)   ;;  %vm177_vm7 = vmand (!%p138_p2), %vm175_vm2, %vm176_vm4  ;;  %vm184_vm8 = vsmask.f32 (!%p138_p2), 7954  ;;  %v187_v16 = vld [vmem:[#allocation2 + $0x10] sm:$0x11] (!%p138_p2) }
   0xb   : > { %374 = vmatpush1.bf16.msra.mxu0 (!%p138_p2), %v1910_v3  ;;  %472 = vmatpush1.bf16.msra.mxu1 (!%p138_p2), %v1911_v4  ;;  %vm178_vm9 = vmor (!%p138_p2), %vm177_vm7, %vm2107_vm5  ;;  %v1921_v21 = vld [vmem:[%s2477_s1 + $0x30] sm:$0xff] (!%p138_p2)   ;;  %vm203_vm11 = vsmask.f32 (!%p138_p2), 4368  ;;  %v1922_v28 = vld [vmem:[%s2477_s1 + $0x80] sm:$0xff] (!%p138_p2)   ;;  %vm287_vm4 = vsmask.f32 (!%p138_p2), 7424 }
   0xc   : > { %375 = vmatprep.subr.bf16.mxu0 (!%p138_p2), %v2017_v1  ;;  %473 = vmatprep.subr.bf16.mxu1 (!%p138_p2), %v2017_v1  ;;  %v180_v22 = vsel (!%p138_p2), %vm178_vm9, 0, %v179_v14  ;;  %vm2125_vm10 = vmand (!%p138_p2), %vm172_vm1, %vm182_vm6  ;;  %v1923_v33 = vld [vmem:[%s2477_s1 + $0x38] sm:$0xff] (!%p138_p2)   ;;  %v1924_v39 = vld [vmem:[%s2477_s1 + $0x88] sm:$0xff] (!%p138_p2)  }
   0xd   : > { %s2489_s13 = smov (!%p161_p3, %s1617_s13), 1  ;;  %181 = vst [vmem:[#allocation2] sm:$0x11] %v180_v22  ;;  %vm185_vm12 = vmand %vm175_vm2, %vm184_vm8  ;;  %v1925_v42 = vld [vmem:[%s2477_s1 + $0x40] sm:$0xff]   ;;  %vm367_vm2 = vcmask 130048   ;;  %v1930_v4 = vld [vmem:[%s2477_s1 + $0x90] sm:$0xff]  }
   0xe   : > { %s1891_s5 = sshll.u32 %s2489_s13, 4  ;;  %vm186_vm13 = vmor %vm185_vm12, %vm2125_vm10  ;;  %191 = vst.msk [vmem:[#allocation2 + $0x4] sm:$0xf] %vm190_vm0, %v2017_v1  ;;  %v1934_v14 = vld [vmem:[%s2477_s1 + $0xb0] sm:$0xff]   ;;  %v1941_v23 = vld [vmem:[%s2477_s1 + $0xd8] sm:$0xff]  }
   0xf   : > { %376 = vmatpush1.bf16.msra.mxu0 %v1912_v5  ;;  %474 = vmatpush1.bf16.msra.mxu1 %v1913_v6  ;;  %s2096_s10 = scalar_lea.vmem %s2476_s0, %s1891_s5  ;;  %v188_v29 = vsel %vm186_vm13, 0, %v187_v16  ;;  %vm2142_vm1 = vmor %vm173_vm3, %vm203_vm11  ;;  %vm535_vm3 = vcmask 1046528   ;;  %v1936_v16 = vld [vmem:[%s2477_s1 + $0xc0] sm:$0xff]   ;;  %s170_s25 = scalar_lea.vmem %s2479_s3, %s1891_s5 }
  0x10   : > { %377 = vmatprep.subr.bf16.mxu0 %v2017_v1  ;;  %475 = vmatprep.subr.bf16.mxu1 %v2017_v1  ;;  %v195_v17 = vld [vmem:[%s2096_s10] sm:$0xff]  ;;  %v196_v18 = vld [vmem:[%s2096_s10 + $0x8] sm:$0xff]  ;;  %189 = vst [vmem:[#allocation2 + $0x10] sm:$0x11] %v188_v29  ;;  %vm2153_vm0 = vmand %vm225_vm15, %vm182_vm6 }
  0x11   : > { %v1893_v19 = vpack.c.bf16 %v195_v17, %v195_v17  ;;  %v1894_v20 = vpack.c.bf16 %v196_v18, %v196_v18  ;;  %194 = vst.msk [vmem:[#allocation2 + $0x14] sm:$0x1] %vm193_vm14, %v2017_v1  ;;  %v1937_v17 = vld [vmem:[%s2477_s1 + $0xc8] sm:$0xff]   ;;  %v1947_v29 = vld [vmem:[%s2477_s1 + $0x130] sm:$0xff]  }
  0x13   : > { %378 = vmatpush1.bf16.msra.mxu0 %v1914_v7  ;;  %476 = vmatpush1.bf16.msra.mxu1 %v1915_v8  ;;  %v206_v24 = vshrl.u32 %v1893_v19, 16  ;;  %v209_v25 = vshll.u32 %v1893_v19, 16  ;;  %v214_v26 = vshrl.u32 %v1894_v20, 16  ;;  %v217_v27 = vshll.u32 %v1894_v20, 16  ;;  %v1938_v19 = vld [vmem:[%s2477_s1 + $0xd0] sm:$0xff]  }
  0x14   : > { %379 = vmatprep.subr.bf16.mxu0 %v2017_v1  ;;  %477 = vmatprep.subr.bf16.mxu1 %v2017_v1  ;;  %v227_v41 = vld [vmem:[#allocation2] sm:$0xf] }
  0x15   : > { %v208_v30 = vrot.slane %v206_v24, 7  ;;  %v216_v31 = vrot.slane %v214_v26, 7  ;;  %v1942_v24 = vld [vmem:[%s2477_s1 + $0xe0] sm:$0xff]   ;;  %v1944_v26 = vld [vmem:[%s2477_s1 + $0xe8] sm:$0xff]  }
  0x17   : > { %380 = vmatpush1.bf16.msra.mxu0 %v1916_v9  ;;  %478 = vmatpush1.bf16.msra.mxu1 %v1917_v10  ;;  %v211_v34 = vor.u32 %v209_v25, %v208_v30  ;;  %v212_v35 = vrot.slane %v208_v30, 4  ;;  %v219_v36 = vor.u32 %v217_v27, %v216_v31  ;;  %v221_v40 = vrot.slane %v216_v31, 4  ;;  %v231_v44 = vld [vmem:[#allocation2 + $0x10] sm:$0x1]  ;;  %v1931_v10 = vld [vmem:[%s2477_s1 + $0x98] sm:$0xff]   ;;  %v1943_v25 = vld [vmem:[%s2477_s1 + $0x120] sm:$0xff]  }
  0x18   : > { %381 = vmatprep.subr.bf16.mxu0 %v2017_v1  ;;  %479 = vmatprep.subr.bf16.mxu1 %v2017_v1  ;;  %v1945_v27 = vld [vmem:[%s2477_s1 + $0x128] sm:$0xff]   ;;  %v1948_v30 = vld [vmem:[%s2477_s1 + $0xf8] sm:$0xff]  }
  0x19   : > { %v220_v38 = vsel %vm2142_vm1, %v212_v35, %v219_v36  ;;  %v228_v43 = vsel %vm2153_vm0, %v211_v34, %v227_v41  ;;  %v232_v45 = vsel %vm2107_vm5, %v221_v40, %v231_v44  ;;  %v1949_v31 = vld [vmem:[%s2477_s1 + $0x138] sm:$0xff]   ;;  %v1951_v34 = vld [vmem:[%s2477_s1 + $0x140] sm:$0xff]   ;;  %v1952_v35 = vld [vmem:[%s2477_s1 + $0x108] sm:$0xff]  }
  0x1a   : > { %230 = vst [vmem:[#allocation2 + $0x8] sm:$0xf] %v220_v38  ;;  %229 = vst [vmem:[#allocation2] sm:$0xf] %v228_v43  ;;  %v1953_v36 = vld [vmem:[%s2477_s1 + $0x148] sm:$0xff]   ;;  %v1954_v38 = vld [vmem:[%s2477_s1 + $0x110] sm:$0xff]  }
  0x1b   : > { %382 = vmatpush1.bf16.msra.mxu0 %v1918_v11  ;;  %480 = vmatpush1.bf16.msra.mxu1 %v1919_v12  ;;  %233 = vst [vmem:[#allocation2 + $0x10] sm:$0x1] %v232_v45  ;;  %v1932_v11 = vld [vmem:[%s2477_s1 + $0xa0] sm:$0xff]   ;;  %v1933_v12 = vld [vmem:[%s2477_s1 + $0xa8] sm:$0xff]   ;;  %v1956_v40 = vld [vmem:[%s2477_s1 + $0x118] sm:$0xff]  }
  0x1c   : > { %383 = vmatprep.subr.bf16.mxu0 %v2017_v1  ;;  %481 = vmatprep.subr.bf16.mxu1 %v2017_v1  ;;  %v1957_v41 = vld [vmem:[%s2477_s1 + $0x158] sm:$0xff]  }
  0x1f   : > { %384 = vmatpush1.bf16.msra.mxu0 %v1920_v15  ;;  %482 = vmatpush1.bf16.msra.mxu1 %v1921_v21  ;;  %v1935_v15 = vld [vmem:[%s2477_s1 + $0xb8] sm:$0xff]  }
  0x20   : > { %385 = vmatprep.subr.bf16.mxu0 %v2017_v1  ;;  %483 = vmatprep.subr.bf16.mxu1 %v2017_v1 }
  0x21   : > { %v235_v46 = vld [vmem:[#allocation2 + $0x8] sm:$0xff]  ;;  %v234_v47 = vld [vmem:[#allocation2] sm:$0xff] }
  0x22   : > { %v510_v48 = vld [vmem:[#allocation2] sm:$0xee]  ;;  %v1647_v49 = vcombine.high %v234_v47, %v235_v46  ;;  %v1646_v50 = vcombine.low %v234_v47, %v235_v46  ;;  %v254_v52 = vld [vmem:[#allocation2 + $0x10] sm:$0x11] }
  0x23   : > { %386 = vmatpush1.bf16.msra.mxu0 %v1922_v28  ;;  %484 = vmatpush1.bf16.msra.mxu1 %v1923_v33  ;;  %v1689_v51 = vcombine.high %v510_v48, %v235_v46  ;;  %v1649_v57 = vcombine.high %v254_v52, %v254_v52  ;;  %v1648_v58 = vcombine.low %v254_v52, %v254_v52  ;;  %v1946_v28 = vld [vmem:[%s2477_s1 + $0xf0] sm:$0xff]   ;;  %v1950_v33 = vld [vmem:[%s2477_s1 + $0x100] sm:$0xff]  }
  0x24   : > { %387 = vmatprep.subr.bf16.mxu0 %v2017_v1  ;;  %485 = vmatprep.subr.bf16.mxu1 %v2017_v1  ;;  %v301_v53 = vshrl.u32 %v1647_v49, 16  ;;  %v303_v54 = vshll.u32 %v1647_v49, 16  ;;  %v289_v55 = vshrl.u32 %v1646_v50, 16  ;;  %v291_v56 = vshll.u32 %v1646_v50, 16 }
  0x25   : > { %1669 = vmatprep.mubr.msk.bf16.mxu1 %vm367_vm2, %v1647_v49  ;;  %v308_v61 = vshll.u32 %v1649_v57, 16  ;;  %v296_v62 = vshll.u32 %v1648_v58, 16  ;;  %v539_v63 = vrot.slane %v1689_v51, 1  ;;  %v540_v0 = vrot.slane %v1649_v57, 1 }
  0x26   : > { %v305_v59 = vrot.slane %v303_v54, 1  ;;  %v293_v60 = vrot.slane %v291_v56, 1  ;;  %v1688_v18 = vcombine.low %v510_v48, %v235_v46  ;;  %v537_v21 = vrot.slane %v1648_v58, 1  ;;  %v1700_v54 = vld [vmem:[%s2478_s2] ss:$0 sm:$0xff] }
  0x27   : > { %388 = vmatpush1.bf16.msra.mxu0 %v1924_v39  ;;  %486 = vmatpush1.bf16.msra.mxu1 %v1925_v42  ;;  %v310_v5 = vrot.slane %v308_v61, 1  ;;  %v298_v6 = vrot.slane %v296_v62, 1  ;;  %v541_v9 = vsel %vm535_vm3, %v539_v63, %v540_v0  ;;  %v1955_v39 = vld [vmem:[%s2477_s1 + $0x150] sm:$0xff]   ;;  %v1960_v42 = vld [vmem:[%s2477_s1 + $0x160] sm:$0xff]  }
  0x28   : > { %600 = vmatprep.subr.bf16.mxu0 %v2017_v1  ;;  %823 = vmatprep.subr.bf16.mxu1 %v2017_v1  ;;  %v306_v2 = vor.u32 %v305_v59, %v301_v53  ;;  %v294_v3 = vor.u32 %v293_v60, %v289_v55  ;;  %v536_v20 = vrot.slane %v1688_v18, 1 }
  0x2a   : > { %502 = vmatmul.mubr.bf16.vlgmr.msra.gmra.mrb[0].mxu1 %v1646_v50  ;;  %v311_v7 = vsel %vm287_vm4, %v306_v2, %v310_v5  ;;  %v299_v8 = vsel %vm287_vm4, %v294_v3, %v298_v6  ;;  %v538_v22 = vsel %vm535_vm3, %v536_v20, %v537_v21 }
  0x2b   : > { %1659 = vmatprep.mubr.msk.bf16.mxu0 %vm367_vm2, %v311_v7  ;;  %824 = vmatpush1.bf16.msra.mxu1 %v1943_v25  ;;  %v680_v7 = vld [vmem:[#allocation2] sm:$0xf] }
  0x2c   : > { %404 = vmatmul.mubr.bf16.vlgmr.msra.gmra.mrb[0].mxu0 %v299_v8  ;;  %825 = vmatprep.subr.bf16.mxu1 %v2017_v1 }
  0x2d   : > { %601 = vmatpush1.bf16.msra.mxu0 %v1930_v4  ;;  %1699 = vmatprep.mubr.msk.bf16.mxu0 %vm367_vm2, %v541_v9 }
  0x2e   : > { %602 = vmatprep.subr.bf16.mxu0 %v2017_v1 }
  0x2f   : > { %826 = vmatpush1.bf16.msra.mxu1 %v1945_v27 }
  0x30   : > { %827 = vmatprep.subr.bf16.mxu1 %v2017_v1 }
  0x31   : > { %603 = vmatpush1.bf16.msra.mxu0 %v1931_v10 }
  0x32   : > { %604 = vmatprep.subr.bf16.mxu0 %v2017_v1 }
  0x33   : > { %828 = vmatpush1.bf16.msra.mxu1 %v1947_v29 }
  0x34   : > { %829 = vmatprep.subr.bf16.mxu1 %v2017_v1 }
  0x35   : > { %605 = vmatpush1.bf16.msra.mxu0 %v1932_v11  ;;  %v684_v11 = vld [vmem:[#allocation2 + $0x10] sm:$0x1] }
  0x36   : > { %606 = vmatprep.subr.bf16.mxu0 %v2017_v1 }
  0x37   : > { %830 = vmatpush1.bf16.msra.mxu1 %v1949_v31 }
  0x38   : > { %831 = vmatprep.subr.bf16.mxu1 %v2017_v1 }
  0x39   : > { %607 = vmatpush1.bf16.msra.mxu0 %v1933_v12 }
  0x3a   : > { %608 = vmatprep.subr.bf16.mxu0 %v2017_v1 }
  0x3b   : > { %832 = vmatpush1.bf16.msra.mxu1 %v1951_v34 }
  0x3c   : > { %833 = vmatprep.subr.bf16.mxu1 %v2017_v1 }
  0x3d   : > { %609 = vmatpush1.bf16.msra.mxu0 %v1934_v14 }
  0x3e   : > { %610 = vmatprep.subr.bf16.mxu0 %v2017_v1 }
  0x3f   : > { %834 = vmatpush1.bf16.msra.mxu1 %v1953_v36 }
  0x40   : > { %835 = vmatprep.subr.bf16.mxu1 %v2017_v1 }
  0x41   : > { %611 = vmatpush1.bf16.msra.mxu0 %v1935_v15 }
  0x42   : > { %612 = vmatprep.subr.bf16.mxu0 %v2017_v1 }
  0x43   : > { %836 = vmatpush1.bf16.msra.mxu1 %v1955_v39 }
  0x44   : > { %837 = vmatprep.subr.bf16.mxu1 %v2017_v1 }
  0x45   : > { %613 = vmatpush1.bf16.msra.mxu0 %v1936_v16 }
  0x46   : > { %614 = vmatprep.subr.bf16.mxu0 %v2017_v1 }
  0x47   : > { %838 = vmatpush1.bf16.msra.mxu1 %v1957_v41 }
  0x48   : > { %839 = vmatprep.subr.bf16.mxu1 %v2017_v1 }
  0x49   : > { %615 = vmatpush1.bf16.msra.mxu0 %v1937_v17 }
  0x4a   : > { %616 = vmatprep.subr.bf16.mxu0 %v2017_v1 }
  0x4b   : > { %840 = vmatpush1.bf16.msra.mxu1 %v1960_v42 }
  0x4c   : > { %1051 = vmatprep.subr.bf16.mxu1 %v2017_v1 }
  0x4d   : > { %617 = vmatpush1.bf16.msra.mxu0 %v1938_v19 }
  0x4e   : > { %921 = vmatprep.subr.bf16.mxu0 %v2017_v1 }
  0x50   : > { %633 = vmatmul.mubr.bf16.vlgmr.msra.gmra.mrb[4].mxu0 %v538_v22 }
  0x51   : > { %922 = vmatpush1.bf16.msra.mxu0 %v1941_v23 }
  0x52   : > { %923 = vmatprep.subr.bf16.mxu0 %v2017_v1 }
  0x55   : > { %924 = vmatpush1.bf16.msra.mxu0 %v1942_v24 }
  0x56   : > { %925 = vmatprep.subr.bf16.mxu0 %v2017_v1 }
  0x59   : > { %926 = vmatpush1.bf16.msra.mxu0 %v1944_v26 }
  0x5a   : > { %927 = vmatprep.subr.bf16.mxu0 %v2017_v1 }
  0x5d   : > { %928 = vmatpush1.bf16.msra.mxu0 %v1946_v28 }
  0x5e   : > { %929 = vmatprep.subr.bf16.mxu0 %v2017_v1 }
  0x61   : > { %930 = vmatpush1.bf16.msra.mxu0 %v1948_v30 }
  0x62   : > { %931 = vmatprep.subr.bf16.mxu0 %v2017_v1 }
  0x65   : > { %932 = vmatpush1.bf16.msra.mxu0 %v1950_v33 }
  0x66   : > { %933 = vmatprep.subr.bf16.mxu0 %v2017_v1 }
  0x69   : > { %934 = vmatpush1.bf16.msra.mxu0 %v1952_v35 }
  0x6a   : > { %935 = vmatprep.subr.bf16.mxu0 %v2017_v1 }
  0x6d   : > { %936 = vmatpush1.bf16.msra.mxu0 %v1954_v38 }
  0x6e   : > { %937 = vmatprep.subr.bf16.mxu0 %v2017_v1 }
  0x71   : > { %938 = vmatpush1.bf16.msra.mxu0 %v1956_v40 }
  0x72   : > { %1275 = vmatprep.subr.bf16.mxu0 %v2017_v1 }
  0xfd   : > { %v503_v43 = vpop.f32.mrb[0].mxu1 }
  0xfe   : > { %v505_v44 = vpop.f32.mrb[1].mxu1 }
  0xff   : > { %v506_v45 = vpop.f32.mrb[2].mxu1  ;;  %v405_v47 = vpop.f32.mrb[0].mxu0  ;;  %v1963_v44 = vld [vmem:[%s2477_s1 + $0x168] sm:$0xff]  }
 0x100   : > { %v508_v46 = vpop.f32.mrb[3].mxu1  ;;  %v504_v48 = vadd.f32 %v503_v43, %v405_v47  ;;  %v407_v49 = vpop.f32.mrb[1].mxu0 }
 0x101   : > { %v408_v50 = vpop.f32.mrb[2].mxu0  ;;  %v1966_v49 = vld [vmem:[%s2477_s1 + $0x178] sm:$0xff]  }
 0x102   : > { %v507_v51 = vadd.f32 %v506_v45, %v408_v50  ;;  %v410_v52 = vpop.f32.mrb[3].mxu0  ;;  %v1967_v50 = vld [vmem:[%s2477_s1 + $0x180] sm:$0xff]  }
 0x103   : > { %v1969_v52 = vld [vmem:[%s2477_s1 + $0x190] sm:$0xff]  }
 0x123   : > { %v634_v53 = vpop.f32.mrb[4].mxu0 }
 0x124   : > { %v641_v55 = vadd.f32 %v634_v53, %v504_v48  ;;  %v636_v56 = vpop.f32.mrb[5].mxu0  ;;  %v1965_v48 = vld [vmem:[%s2477_s1 + $0x170] sm:$0xff]   ;;  %v1970_v53 = vld [vmem:[%s2477_s1 + $0x198] sm:$0xff]  }
 0x125   : > { %v637_v57 = vpop.f32.mrb[6].mxu0  ;;  %v1972_v56 = vld [vmem:[%s2477_s1 + $0x1a8] sm:$0xff]  }
 0x126   : > { %v650_v58 = vadd.f32 %v1700_v54, %v641_v55  ;;  %v642_v59 = vadd.f32 %v637_v57, %v507_v51  ;;  %v639_v60 = vpop.f32.mrb[7].mxu0  ;;  %v1968_v51 = vld [vmem:[%s2477_s1 + $0x188] sm:$0xff]  }
 0x127   : > { %v1974_v60 = vld [vmem:[%s2477_s1 + $0x1b0] sm:$0xff]  }
 0x128   : > { %v652_v61 = vmax.f32 %v650_v58, 0.0  ;;  %v651_v62 = vadd.f32 %v1700_v54, %v642_v59  ;;  %v1971_v54 = vld [vmem:[%s2477_s1 + $0x1a0] sm:$0xff]  }
 0x12a   : > { %v1895_v63 = vpack.c.bf16 %v652_v61, %v652_v61  ;;  %v653_v0 = vmax.f32 %v651_v62, 0.0  ;;  %v1975_v61 = vld [vmem:[%s2477_s1 + $0x1b8] sm:$0xff]  }
 0x12b   : > { %v1976_v62 = vld [vmem:[%s2477_s1 + $0x1f8] sm:$0xff]  }
 0x12c   : > { %v661_v2 = vshrl.u32 %v1895_v63, 16  ;;  %v1896_v3 = vpack.c.bf16 %v653_v0, %v653_v0  ;;  %v664_v5 = vshll.u32 %v1895_v63, 16  ;;  %v1977_v63 = vld [vmem:[%s2477_s1 + $0x1c0] sm:$0xff]  }
 0x12d   : > { %v1978_v0 = vld [vmem:[%s2477_s1 + $0x200] sm:$0xff]  }
 0x12e   : > { %v663_v4 = vrot.slane %v661_v2, 7  ;;  %v669_v6 = vshrl.u32 %v1896_v3, 16  ;;  %v672_v10 = vshll.u32 %v1896_v3, 16  ;;  %v1979_v2 = vld [vmem:[%s2477_s1 + $0x1c8] sm:$0xff]  }
 0x12f   : > { %v1980_v3 = vld [vmem:[%s2477_s1 + $0x208] sm:$0xff]  }
 0x130   : > { %v666_v8 = vor.u32 %v664_v5, %v663_v4  ;;  %v671_v9 = vrot.slane %v669_v6, 7  ;;  %v667_v12 = vrot.slane %v663_v4, 4  ;;  %v1981_v4 = vld [vmem:[%s2477_s1 + $0x1d0] sm:$0xff]   ;;  %v1983_v6 = vld [vmem:[%s2477_s1 + $0x1d8] sm:$0xff]  }
 0x131   : > { %v1982_v5 = vld [vmem:[%s2477_s1 + $0x210] sm:$0xff]  }
 0x132   : > { %v681_v14 = vsel %vm2153_vm0, %v666_v8, %v680_v7  ;;  %v674_v15 = vor.u32 %v672_v10, %v671_v9  ;;  %v676_v16 = vrot.slane %v671_v9, 4  ;;  %v1984_v7 = vld [vmem:[%s2477_s1 + $0x218] sm:$0xff]   ;;  %v1985_v8 = vld [vmem:[%s2477_s1 + $0x1e0] sm:$0xff]   ;;  %v1987_v10 = vld [vmem:[%s2477_s1 + $0x1e8] sm:$0xff]  }
 0x133   : > { %682 = vst [vmem:[#allocation2] sm:$0xf] %v681_v14  ;;  %v1986_v9 = vld [vmem:[%s2477_s1 + $0x220] sm:$0xff]   ;;  %v1990_v14 = vld [vmem:[%s2477_s1 + $0x230] sm:$0xff]  }
 0x134   : > { %v675_v17 = vsel %vm2142_vm1, %v667_v12, %v674_v15  ;;  %v685_v18 = vsel %vm2107_vm5, %v676_v16, %v684_v11  ;;  %v1988_v11 = vld [vmem:[%s2477_s1 + $0x228] sm:$0xff]   ;;  %v1989_v12 = vld [vmem:[%s2477_s1 + $0x1f0] sm:$0xff]   ;;  %v1993_v15 = vld [vmem:[%s2477_s1 + $0x238] sm:$0xff]  }
 0x135   : > { %683 = vst [vmem:[#allocation2 + $0x8] sm:$0xf] %v675_v17  ;;  %686 = vst [vmem:[#allocation2 + $0x10] sm:$0x1] %v685_v18 }
 0x13a   : > { %v687_v19 = vld [vmem:[#allocation2] sm:$0xff] }
 0x13b   : > { %v962_v26 = vld [vmem:[#allocation2] sm:$0xee] }
 0x13c   : > { %v688_v20 = vld [vmem:[#allocation2 + $0x8] sm:$0xff]  ;;  %v708_v21 = vld [vmem:[#allocation2 + $0x10] sm:$0x11] }
 0x13d   : > { %v1740_v22 = vcombine.high %v687_v19, %v688_v20  ;;  %v1739_v23 = vcombine.low %v687_v19, %v688_v20  ;;  %v1742_v24 = vcombine.high %v708_v21, %v708_v21  ;;  %v1741_v25 = vcombine.low %v708_v21, %v708_v21 }
 0x13e   : > { %v1782_v29 = vcombine.high %v962_v26, %v688_v20  ;;  %v1781_v55 = vcombine.low %v962_v26, %v688_v20 }
 0x13f   : > { %1762 = vmatprep.mubr.msk.bf16.mxu0 %vm367_vm2, %v1740_v22  ;;  %v756_v27 = vshll.u32 %v1740_v22, 16  ;;  %v761_v28 = vshll.u32 %v1742_v24, 16  ;;  %v744_v30 = vshll.u32 %v1739_v23, 16  ;;  %v749_v31 = vshll.u32 %v1741_v25, 16 }
 0x140   : > { %954 = vmatmul.mubr.bf16.vlgmr.msra.gmra.mrb[8].mxu0 %v1739_v23  ;;  %v754_v33 = vshrl.u32 %v1740_v22, 16  ;;  %v742_v35 = vshrl.u32 %v1739_v23, 16  ;;  %v990_v40 = vrot.slane %v1782_v29, 1  ;;  %v991_v41 = vrot.slane %v1742_v24, 1 }
 0x141   : > { %v758_v34 = vrot.slane %v756_v27, 1  ;;  %v746_v36 = vrot.slane %v744_v30, 1  ;;  %v763_v39 = vrot.slane %v761_v28, 1  ;;  %v751_v43 = vrot.slane %v749_v31, 1  ;;  %1276 = vmatpush1.bf16.msra.mxu0 %v1976_v62  ;;  %v1794_v27 = vld [vmem:[%s2478_s2 + $0x1] ss:$0 sm:$0xff] }
 0x142   : > { %v992_v47 = vsel %vm535_vm3, %v990_v40, %v991_v41  ;;  %v987_v57 = vrot.slane %v1781_v55, 1  ;;  %v988_v58 = vrot.slane %v1741_v25, 1  ;;  %1277 = vmatprep.subr.bf16.mxu0 %v2017_v1 }
 0x143   : > { %v759_v38 = vor.u32 %v758_v34, %v754_v33  ;;  %v747_v42 = vor.u32 %v746_v36, %v742_v35 }
 0x144   : > { %v989_v59 = vsel %vm535_vm3, %v987_v57, %v988_v58 }
 0x145   : > { %v764_v45 = vsel %vm287_vm4, %v759_v38, %v763_v39  ;;  %v752_v46 = vsel %vm287_vm4, %v747_v42, %v751_v43  ;;  %1278 = vmatpush1.bf16.msra.mxu0 %v1978_v0 }
 0x146   : > { %1752 = vmatprep.mubr.msk.bf16.mxu1 %vm367_vm2, %v764_v45  ;;  %1279 = vmatprep.subr.bf16.mxu0 %v2017_v1 }
 0x147   : > { %856 = vmatmul.mubr.bf16.vlgmr.msra.gmra.mrb[4].mxu1 %v752_v46 }
 0x148   : > { %1052 = vmatpush1.bf16.msra.mxu1 %v1963_v44  ;;  %1792 = vmatprep.mubr.msk.bf16.mxu1 %vm367_vm2, %v992_v47 }
 0x149   : > { %1053 = vmatprep.subr.bf16.mxu1 %v2017_v1  ;;  %1280 = vmatpush1.bf16.msra.mxu0 %v1980_v3 }
 0x14a   : > { %1281 = vmatprep.subr.bf16.mxu0 %v2017_v1 }
 0x14c   : > { %1054 = vmatpush1.bf16.msra.mxu1 %v1965_v48  ;;  %v1132_v48 = vld [vmem:[#allocation2] sm:$0xf] }
 0x14d   : > { %1055 = vmatprep.subr.bf16.mxu1 %v2017_v1  ;;  %1282 = vmatpush1.bf16.msra.mxu0 %v1982_v5 }
 0x14e   : > { %1283 = vmatprep.subr.bf16.mxu0 %v2017_v1 }
 0x150   : > { %1056 = vmatpush1.bf16.msra.mxu1 %v1966_v49 }
 0x151   : > { %1057 = vmatprep.subr.bf16.mxu1 %v2017_v1  ;;  %1284 = vmatpush1.bf16.msra.mxu0 %v1984_v7 }
 0x152   : > { %1285 = vmatprep.subr.bf16.mxu0 %v2017_v1 }
 0x154   : > { %1058 = vmatpush1.bf16.msra.mxu1 %v1967_v50 }
 0x155   : > { %1059 = vmatprep.subr.bf16.mxu1 %v2017_v1  ;;  %1286 = vmatpush1.bf16.msra.mxu0 %v1986_v9 }
 0x156   : > { %1287 = vmatprep.subr.bf16.mxu0 %v2017_v1 }
 0x158   : > { %1060 = vmatpush1.bf16.msra.mxu1 %v1968_v51 }
 0x159   : > { %1061 = vmatprep.subr.bf16.mxu1 %v2017_v1  ;;  %1288 = vmatpush1.bf16.msra.mxu0 %v1988_v11 }
 0x15a   : > { %1289 = vmatprep.subr.bf16.mxu0 %v2017_v1 }
 0x15c   : > { %1062 = vmatpush1.bf16.msra.mxu1 %v1969_v52 }
 0x15d   : > { %1063 = vmatprep.subr.bf16.mxu1 %v2017_v1  ;;  %1290 = vmatpush1.bf16.msra.mxu0 %v1990_v14  ;;  %v1996_v14 = vld [vmem:[%s2477_s1 + $0x240] sm:$0xff]  }
 0x15e   : > { %1291 = vmatprep.subr.bf16.mxu0 %v2017_v1 }
 0x160   : > { %1064 = vmatpush1.bf16.msra.mxu1 %v1970_v53  ;;  %v1136_v53 = vld [vmem:[#allocation2 + $0x10] sm:$0x1] }
 0x161   : > { %1065 = vmatprep.subr.bf16.mxu1 %v2017_v1  ;;  %1292 = vmatpush1.bf16.msra.mxu0 %v1993_v15 }
 0x162   : > { %1503 = vmatprep.subr.bf16.mxu0 %v2017_v1 }
 0x164   : > { %1066 = vmatpush1.bf16.msra.mxu1 %v1971_v54 }
 0x165   : > { %1067 = vmatprep.subr.bf16.mxu1 %v2017_v1 }
 0x168   : > { %1068 = vmatpush1.bf16.msra.mxu1 %v1972_v56 }
 0x169   : > { %1373 = vmatprep.subr.bf16.mxu1 %v2017_v1 }
 0x16b   : > { %1084 = vmatmul.mubr.bf16.vlgmr.msra.gmra.mrb[8].mxu1 %v989_v59 }
 0x16c   : > { %1374 = vmatpush1.bf16.msra.mxu1 %v1974_v60 }
 0x16d   : > { %1375 = vmatprep.subr.bf16.mxu1 %v2017_v1 }
 0x170   : > { %1376 = vmatpush1.bf16.msra.mxu1 %v1975_v61 }
 0x171   : > { %1377 = vmatprep.subr.bf16.mxu1 %v2017_v1 }
 0x174   : > { %1378 = vmatpush1.bf16.msra.mxu1 %v1977_v63 }
 0x175   : > { %1379 = vmatprep.subr.bf16.mxu1 %v2017_v1 }
 0x178   : > { %1380 = vmatpush1.bf16.msra.mxu1 %v1979_v2 }
 0x179   : > { %1381 = vmatprep.subr.bf16.mxu1 %v2017_v1 }
 0x17c   : > { %1382 = vmatpush1.bf16.msra.mxu1 %v1981_v4 }
 0x17d   : > { %1383 = vmatprep.subr.bf16.mxu1 %v2017_v1 }
 0x180   : > { %1384 = vmatpush1.bf16.msra.mxu1 %v1983_v6 }
 0x181   : > { %1385 = vmatprep.subr.bf16.mxu1 %v2017_v1 }
 0x184   : > { %1386 = vmatpush1.bf16.msra.mxu1 %v1985_v8 }
 0x185   : > { %1387 = vmatprep.subr.bf16.mxu1 %v2017_v1 }
 0x188   : > { %1388 = vmatpush1.bf16.msra.mxu1 %v1987_v10 }
 0x189   : > { %1389 = vmatprep.subr.bf16.mxu1 %v2017_v1 }
 0x18c   : > { %1390 = vmatpush1.bf16.msra.mxu1 %v1989_v12 }
 0x213   : > { %v955_v16 = vpop.f32.mrb[8].mxu0 }
 0x214   : > { %v957_v17 = vpop.f32.mrb[9].mxu0 }
 0x215   : > { %v958_v18 = vpop.f32.mrb[10].mxu0 }
 0x216   : > { %v960_v19 = vpop.f32.mrb[11].mxu0 }
 0x217   : > { %v1999_v19 = vld [vmem:[%s2477_s1 + $0x250] sm:$0xff]  }
 0x21a   : > { %v857_v20 = vpop.f32.mrb[4].mxu1 }
 0x21b   : > { %v956_v21 = vadd.f32 %v955_v16, %v857_v20  ;;  %v859_v22 = vpop.f32.mrb[5].mxu1  ;;  %v2000_v20 = vld [vmem:[%s2477_s1 + $0x258] sm:$0xff]  }
 0x21c   : > { %v860_v23 = vpop.f32.mrb[6].mxu1  ;;  %v2002_v22 = vld [vmem:[%s2477_s1 + $0x268] sm:$0xff]  }
 0x21d   : > { %v959_v24 = vadd.f32 %v958_v18, %v860_v23  ;;  %v862_v25 = vpop.f32.mrb[7].mxu1  ;;  %v1998_v18 = vld [vmem:[%s2477_s1 + $0x248] sm:$0xff]   ;;  %v2003_v23 = vld [vmem:[%s2477_s1 + $0x270] sm:$0xff]  }
 0x23e   : > { %v1085_v26 = vpop.f32.mrb[8].mxu1 }
 0x23f   : > { %v1092_v28 = vadd.f32 %v1085_v26, %v956_v21  ;;  %v1087_v29 = vpop.f32.mrb[9].mxu1  ;;  %v2001_v21 = vld [vmem:[%s2477_s1 + $0x260] sm:$0xff]  }
 0x240   : > { %v1088_v30 = vpop.f32.mrb[10].mxu1  ;;  %v2005_v26 = vld [vmem:[%s2477_s1 + $0x280] sm:$0xff]  }
 0x241   : > { %v1102_v31 = vadd.f32 %v1794_v27, %v1092_v28  ;;  %v1093_v33 = vadd.f32 %v1088_v30, %v959_v24  ;;  %v1090_v34 = vpop.f32.mrb[11].mxu1  ;;  %v2004_v24 = vld [vmem:[%s2477_s1 + $0x278] sm:$0xff]  }
 0x243   : > { %v1104_v35 = vmax.f32 %v1102_v31, 0.0  ;;  %v1103_v36 = vadd.f32 %v1794_v27, %v1093_v33 }
 0x245   : > { %v1897_v38 = vpack.c.bf16 %v1104_v35, %v1104_v35  ;;  %v1105_v39 = vmax.f32 %v1103_v36, 0.0 }
 0x247   : > { %v1113_v40 = vshrl.u32 %v1897_v38, 16  ;;  %v1898_v41 = vpack.c.bf16 %v1105_v39, %v1105_v39  ;;  %v1116_v43 = vshll.u32 %v1897_v38, 16 }
 0x249   : > { %v1115_v42 = vrot.slane %v1113_v40, 7  ;;  %v1121_v44 = vshrl.u32 %v1898_v41, 16  ;;  %v1124_v47 = vshll.u32 %v1898_v41, 16 }
 0x24b   : > { %v1118_v45 = vor.u32 %v1116_v43, %v1115_v42  ;;  %v1123_v46 = vrot.slane %v1121_v44, 7  ;;  %v1119_v49 = vrot.slane %v1115_v42, 4  ;;  %v1888_v42 = vld [vmem:[%s2478_s2 + $0x2] ss:$0 sm:$0xff] }
 0x24d   : > { %v1133_v50 = vsel %vm2153_vm0, %v1118_v45, %v1132_v48  ;;  %v1126_v51 = vor.u32 %v1124_v47, %v1123_v46  ;;  %v1128_v52 = vrot.slane %v1123_v46, 4 }
 0x24e   : > { %1134 = vst [vmem:[#allocation2] sm:$0xf] %v1133_v50 }
 0x24f   : > { %v1127_v54 = vsel %vm2142_vm1, %v1119_v49, %v1126_v51  ;;  %v1137_v55 = vsel %vm2107_vm5, %v1128_v52, %v1136_v53  ;;  %v2007_v49 = vld [vmem:[%s2096_s10] sm:$0xff]  ;;  %v2008_v53 = vld [vmem:[%s2096_s10 + $0x8] sm:$0xff] }
 0x250   : > { %1135 = vst [vmem:[#allocation2 + $0x8] sm:$0xf] %v1127_v54  ;;  %1138 = vst [vmem:[#allocation2 + $0x10] sm:$0x1] %v1137_v55 }
 0x255   : > { %v1139_v56 = vld [vmem:[#allocation2] sm:$0xff] }
 0x256   : > { %v1414_v62 = vld [vmem:[#allocation2] sm:$0xee] }
 0x257   : > { %v1140_v57 = vld [vmem:[#allocation2 + $0x8] sm:$0xff]  ;;  %v1160_v58 = vld [vmem:[#allocation2 + $0x10] sm:$0x11] }
 0x258   : > { %v1834_v59 = vcombine.high %v1139_v56, %v1140_v57  ;;  %v1833_v60 = vcombine.low %v1139_v56, %v1140_v57  ;;  %v1836_v61 = vcombine.high %v1160_v58, %v1160_v58  ;;  %v1835_v37 = vcombine.low %v1160_v58, %v1160_v58 }
 0x259   : > { %v1876_v2 = vcombine.high %v1414_v62, %v1140_v57  ;;  %v1875_v25 = vcombine.low %v1414_v62, %v1140_v57 }
 0x25a   : > { %1856 = vmatprep.mubr.msk.bf16.mxu1 %vm367_vm2, %v1834_v59  ;;  %v1208_v63 = vshll.u32 %v1834_v59, 16  ;;  %v1213_v0 = vshll.u32 %v1836_v61, 16  ;;  %v1196_v32 = vshll.u32 %v1833_v60, 16  ;;  %v1201_v3 = vshll.u32 %v1835_v37, 16 }
 0x25b   : > { %1406 = vmatmul.mubr.bf16.vlgmr.msra.gmra.mrb[12].mxu1 %v1833_v60  ;;  %v1206_v13 = vshrl.u32 %v1834_v59, 16  ;;  %v1194_v5 = vshrl.u32 %v1833_v60, 16  ;;  %v1442_v9 = vrot.slane %v1876_v2, 1  ;;  %v1443_v10 = vrot.slane %v1836_v61, 1 }
 0x25c   : > { %v1210_v4 = vrot.slane %v1208_v63, 1  ;;  %v1198_v6 = vrot.slane %v1196_v32, 1  ;;  %v1215_v8 = vrot.slane %v1213_v0, 1  ;;  %v1203_v12 = vrot.slane %v1201_v3, 1 }
 0x25d   : > { %v1444_v17 = vsel %vm535_vm3, %v1442_v9, %v1443_v10  ;;  %v1439_v27 = vrot.slane %v1875_v25, 1  ;;  %v1440_v28 = vrot.slane %v1835_v37, 1 }
 0x25e   : > { %v1211_v7 = vor.u32 %v1210_v4, %v1206_v13  ;;  %v1199_v11 = vor.u32 %v1198_v6, %v1194_v5 }
 0x25f   : > { %v1441_v29 = vsel %vm535_vm3, %v1439_v27, %v1440_v28 }
 0x260   : > { %v1216_v15 = vsel %vm287_vm4, %v1211_v7, %v1215_v8  ;;  %v1204_v16 = vsel %vm287_vm4, %v1199_v11, %v1203_v12 }
 0x261   : > { %1846 = vmatprep.mubr.msk.bf16.mxu0 %vm367_vm2, %v1216_v15 }
 0x262   : > { %1308 = vmatmul.mubr.bf16.vlgmr.msra.gmra.mrb[12].mxu0 %v1204_v16 }
 0x263   : > { %1504 = vmatpush1.bf16.msra.mxu0 %v1996_v14  ;;  %1886 = vmatprep.mubr.msk.bf16.mxu0 %vm367_vm2, %v1444_v17 }
 0x264   : > { %1505 = vmatprep.subr.bf16.mxu0 %v2017_v1 }
 0x267   : > { %1506 = vmatpush1.bf16.msra.mxu0 %v1998_v18 }
 0x268   : > { %1507 = vmatprep.subr.bf16.mxu0 %v2017_v1 }
 0x26b   : > { %1508 = vmatpush1.bf16.msra.mxu0 %v1999_v19 }
 0x26c   : > { %1509 = vmatprep.subr.bf16.mxu0 %v2017_v1 }
 0x26f   : > { %1510 = vmatpush1.bf16.msra.mxu0 %v2000_v20 }
 0x270   : > { %1511 = vmatprep.subr.bf16.mxu0 %v2017_v1 }
 0x273   : > { %1512 = vmatpush1.bf16.msra.mxu0 %v2001_v21 }
 0x274   : > { %1513 = vmatprep.subr.bf16.mxu0 %v2017_v1 }
 0x277   : > { %1514 = vmatpush1.bf16.msra.mxu0 %v2002_v22 }
 0x278   : > { %1515 = vmatprep.subr.bf16.mxu0 %v2017_v1 }
 0x27b   : > { %1516 = vmatpush1.bf16.msra.mxu0 %v2003_v23 }
 0x27c   : > { %1517 = vmatprep.subr.bf16.mxu0 %v2017_v1 }
 0x27f   : > { %1518 = vmatpush1.bf16.msra.mxu0 %v2004_v24 }
 0x280   : > { %1519 = vmatprep.subr.bf16.mxu0 %v2017_v1 }
 0x283   : > { %1520 = vmatpush1.bf16.msra.mxu0 %v2005_v26 }
 0x286   : > { %1536 = vmatmul.mubr.bf16.vlgmr.msra.gmra.mrb[16].mxu0 %v1441_v29 }
 0x32e   : > { %v1407_v30 = vpop.f32.mrb[12].mxu1 }
 0x32f   : > { %v1409_v31 = vpop.f32.mrb[13].mxu1 }
 0x330   : > { %v1410_v33 = vpop.f32.mrb[14].mxu1 }
 0x331   : > { %v1412_v34 = vpop.f32.mrb[15].mxu1 }
 0x335   : > { %v1309_v35 = vpop.f32.mrb[12].mxu0 }
 0x336   : > { %v1408_v36 = vadd.f32 %v1407_v30, %v1309_v35  ;;  %v1311_v38 = vpop.f32.mrb[13].mxu0 }
 0x337   : > { %v1312_v39 = vpop.f32.mrb[14].mxu0 }
 0x338   : > { %v1411_v40 = vadd.f32 %v1410_v33, %v1312_v39  ;;  %v1314_v41 = vpop.f32.mrb[15].mxu0 }
 0x359   : > { %v1537_v1 = vpop.f32.mrb[16].mxu0 }
 0x35a   : > { %v1544_v43 = vadd.f32 %v1537_v1, %v1408_v36  ;;  %v1539_v44 = vpop.f32.mrb[17].mxu0 }
 0x35b   : > { %v1540_v45 = vpop.f32.mrb[18].mxu0 }
 0x35c   : > { %v1554_v46 = vadd.f32 %v1888_v42, %v1544_v43  ;;  %v1545_v47 = vadd.f32 %v1540_v45, %v1411_v40  ;;  %v1542_v48 = vpop.f32.mrb[19].mxu0 }
 0x35e   : > { %v1556_v50 = vadd.f32 %v2007_v49, %v1554_v46  ;;  %v1555_v51 = vadd.f32 %v1888_v42, %v1545_v47 }
 0x360   : > { %v1558_v52 = vmax.f32 %v1556_v50, 0.0  ;;  %v1557_v54 = vadd.f32 %v2008_v53, %v1555_v51 }
 0x362   : > { %1560 = vst [vmem:[%s170_s25] sm:$0xff] %v1558_v52  ;;  %v1559_v55 = vmax.f32 %v1557_v54, 0.0 }
 0x364   : > { %1561 = vst [vmem:[%s170_s25 + $0x8] sm:$0xff] %v1559_v55 }
 0x365 PF: > { %s13_s12 = sadd.s32 1, %s2015_s12  }
 0x366   : > { %p10_p4 = scmp.ge.s32.totalorder %s13_s12, 4  }
 0x368   :  { %12 = sbr.rel (!%p10_p4) target bundleno = 1 (0x1), region = 72 }

</bundles_post_ra>
